<compile_context>
chip_gen: v6e
topology: v6e:2x2x1
jax: 0.10.0
libtpu: 0.0.40
codegen_flags: <defaults>
</compile_context>

<pallas_src>
import functools

import jax
import jax.numpy as jnp
from jax import lax
from jax.experimental import pallas as pl
from jax.experimental.pallas import tpu as pltpu


def _round_up(x, m):
    return ((x + m - 1) // m) * m


def _dice_kernel(logits_ref, tgt_ref, out_ref, inter_ref, union_ref, *,
                 ignore_index, tile_p, p_valid):
    i = pl.program_id(1)                  # reduction axis over pixel tiles
    n_tiles = pl.num_programs(1)

    @pl.when(i == 0)
    def _():
        inter_ref[...] = jnp.zeros_like(inter_ref)
        union_ref[...] = jnp.zeros_like(union_ref)

    x = logits_ref[...].astype(jnp.float32)            # (C, TP) lane-dense
    t = tgt_ref[...]                                   # (1, TP) int32
    num_classes = x.shape[0]

    # Lane validity for the (possibly partial) last tile. Pixels past H*W read
    # whatever is left in the VMEM buffer, so they must be neutralized with a
    # select (NaN * 0 == NaN, so a multiplicative mask is not enough).
    lane = lax.broadcasted_iota(jnp.int32, (1, tile_p), 1)
    valid = (i * tile_p + lane) < p_valid               # (1, TP) bool
    mask = jnp.where(valid & (t != ignore_index), 1.0, 0.0)   # (1, TP) f32

    # Softmax over the class (sublane) axis; purely per-lane, so garbage in
    # invalid lanes cannot pollute valid lanes. The reciprocal goes to the EUP
    # (approx=False keeps exact f32 parity with the PyTorch reference).
    m = jnp.max(x, axis=0, keepdims=True)               # (1, TP)
    e = jnp.exp(x - m)                                   # (C, TP)
    inv = mask * pl.reciprocal(jnp.sum(e, axis=0, keepdims=True), approx=False)
    pm = jnp.where(valid, e * inv, 0.0)                  # probs * mask, NaN-free

    t_c = jnp.clip(t, 0, num_classes - 1)
    cls_ids = lax.broadcasted_iota(jnp.int32, x.shape, 0)
    hit = cls_ids == t_c                                  # (C, TP) bool
    onehot = jnp.where(hit, mask, 0.0)                    # masked one-hot

    # Steady state: lane-parallel VPU adds only, no per-step cross-lane work.
    inter_ref[...] += jnp.where(hit, pm, 0.0)             # probs * onehot
    union_ref[...] += pm + onehot

    # Once per batch: single cross-lane (XLU) reduction, tiny (C, 2) output.
    @pl.when(i == n_tiles - 1)
    def _():
        out_ref[:, 0:1] = jnp.sum(inter_ref[...], axis=1, keepdims=True)
        out_ref[:, 1:2] = jnp.sum(union_ref[...], axis=1, keepdims=True)


def dice_loss(logits, targets, *, smooth=1e-5, ignore_index=255, tile_p=131072):
    """logits: (N, C, H, W) float; targets: (N, H, W) int. Returns scalar f32."""
    n, c, h, w = logits.shape
    p = h * w

    # Free reshapes only: native NCHW layout is already lane-dense per batch.
    x = logits.reshape(n, c, p)
    t = targets.reshape(n, 1, p).astype(jnp.int32)

    # Tile sizing: lane multiple of 128, as large as a ~16 MiB VMEM budget
    # allows (fits the smallest scoped-VMEM defaults with headroom).
    # Budget = 2x double-buffered logits tile + 2x targets tile (1-row block
    # pads to 8 sublanes) + two f32 scratch accumulators.
    c_pad = _round_up(max(c, 8), 8)
    in_bytes = logits.dtype.itemsize
    bytes_per_pixel = 2 * in_bytes * c_pad + 2 * 4 * 8 + 2 * 4 * c_pad
    vmem_budget = 16 << 20
    cap = max(128, ((vmem_budget // bytes_per_pixel) // 128) * 128)
    tile_p = min(tile_p, cap, _round_up(p, 128))
    tile_p = _round_up(tile_p, 128)
    n_tiles = -(-p // tile_p)

    kernel = functools.partial(_dice_kernel, ignore_index=int(ignore_index),
                               tile_p=tile_p, p_valid=p)

    partial_sums = pl.pallas_call(
        kernel,
        out_shape=jax.ShapeDtypeStruct((n, c, 2), jnp.float32),
        grid_spec=pltpu.PrefetchScalarGridSpec(
            num_scalar_prefetch=0,
            grid=(n, n_tiles),
            in_specs=[
                pl.BlockSpec((None, c, tile_p), lambda b, i: (b, 0, i)),
                pl.BlockSpec((None, 1, tile_p), lambda b, i: (b, 0, i)),
            ],
            out_specs=pl.BlockSpec((None, c, 2), lambda b, i: (b, 0, 0)),
            scratch_shapes=[
                pltpu.VMEM((c, tile_p), jnp.float32),   # intersect accumulator
                pltpu.VMEM((c, tile_p), jnp.float32),   # union accumulator
            ],
        ),
        compiler_params=pltpu.CompilerParams(
            dimension_semantics=("parallel", "arbitrary"),
            vmem_limit_bytes=32 << 20),
    )(x, t)

    # Tiny epilogue on a (N, C, 2) array.
    sums = jnp.sum(partial_sums, axis=0)                 # (C, 2)
    intersect = sums[:, 0]
    union = sums[:, 1]
    dice = (2.0 * intersect + smooth) / (union + smooth)
    return 1.0 - jnp.mean(dice)


def _dice_loss_ref(logits, targets, smooth=1e-5, ignore_index=255):
    num_classes = logits.shape[1]
    probs = jax.nn.softmax(logits.astype(jnp.float32), axis=1)
    mask = (targets != ignore_index)[:, None, :, :].astype(jnp.float32)
    probs = probs * mask
    t_clamped = jnp.clip(targets, 0, num_classes - 1)
    t_onehot = jax.nn.one_hot(t_clamped, num_classes, dtype=jnp.float32)
    t_onehot = jnp.transpose(t_onehot, (0, 3, 1, 2)) * mask
    intersect = jnp.sum(probs * t_onehot, axis=(0, 2, 3))
    union = jnp.sum(probs, axis=(0, 2, 3)) + jnp.sum(t_onehot, axis=(0, 2, 3))
    dice = (2.0 * intersect + smooth) / (union + smooth)
    return 1.0 - jnp.mean(dice)


if __name__ == "__main__":
    key = jax.random.PRNGKey(0)
    k1, k2, k3 = jax.random.split(key, 3)

    N, C, H, W = 2, 4, 16, 16
    logits = jax.random.normal(k1, (N, C, H, W), dtype=jnp.float32)
    targets = jax.random.randint(k2, (N, H, W), 0, C, dtype=jnp.int32)
    # sprinkle some ignore_index pixels to exercise the mask path
    ignore_mask = jax.random.bernoulli(k3, 0.1, (N, H, W))
    targets = jnp.where(ignore_mask, jnp.int32(255), targets)

    loss = jax.jit(dice_loss)(logits, targets)
    loss = jax.block_until_ready(loss)
    ref = _dice_loss_ref(logits, targets)
    assert jnp.allclose(loss, ref, atol=1e-5, rtol=1e-5), (loss, ref)

    # Ragged spatial size (H*W not a multiple of 128) exercises the in-kernel
    # tail masking path (no host-side padding pass over logits).
    k4, k5 = jax.random.split(k1)
    logits2 = jax.random.normal(k4, (1, 3, 10, 10), dtype=jnp.float32)
    targets2 = jax.random.randint(k5, (1, 10, 10), 0, 3, dtype=jnp.int32)
    loss2 = jax.block_until_ready(jax.jit(dice_loss)(logits2, targets2))
    ref2 = _dice_loss_ref(logits2, targets2)
    assert jnp.allclose(loss2, ref2, atol=1e-5, rtol=1e-5), (loss2, ref2)

    print("KERNEL_OK")
</pallas_src>

<mosaic_0001>
module attributes {stable_mosaic.version = 11 : i64} {
  func.func @_dice_kernel(%arg0: i32, %arg1: i32, %arg2: memref<1x4x256xf32, #tpu.memory_space<vmem>>, %arg3: memref<1x1x256xi32, #tpu.memory_space<vmem>>, %arg4: memref<1x4x2xf32, #tpu.memory_space<vmem>>, %arg5: memref<4x256xf32, #tpu.memory_space<vmem>>, %arg6: memref<4x256xf32, #tpu.memory_space<vmem>>) attributes {dimension_semantics = [#tpu.dimension_semantics<parallel>, #tpu.dimension_semantics<arbitrary>], iteration_bounds = array<i64: 2, 1>, scalar_prefetch = 0 : i64, scratch_operands = 2 : i64, tpu.core_type = #tpu.core_type<tc>, window_params = [{transform_indices = @transform_0, window_bounds = array<i64: 1, 4, 256>}, {transform_indices = @transform_1, window_bounds = array<i64: 1, 1, 256>}, {transform_indices = @transform_2, window_bounds = array<i64: 1, 4, 2>}]} {
    %c0_i32 = arith.constant 0 : i32
    %0 = arith.cmpi eq, %arg1, %c0_i32 : i32
    %1 = arith.extui %0 : i1 to i32
    %c0_i32_0 = arith.constant 0 : i32
    %2 = arith.cmpi ne, %1, %c0_i32_0 : i32
    scf.if %2 {
      %cst_24 = arith.constant 0.000000e+00 : f32
      %57 = vector.broadcast %cst_24 : f32 to vector<4x256xf32>
      %c0_25 = arith.constant 0 : index
      %c0_26 = arith.constant 0 : index
      %58 = vector.load %arg5[%c0_25, %c0_26] : memref<4x256xf32, #tpu.memory_space<vmem>>, vector<4x256xf32>
      tpu.vector_store %arg5[%c0_25, %c0_26], %57 {strides = array<i32>} : memref<4x256xf32, #tpu.memory_space<vmem>>, vector<4x256xf32>,
      %cst_27 = arith.constant 0.000000e+00 : f32
      %59 = vector.broadcast %cst_27 : f32 to vector<4x256xf32>
      %c0_28 = arith.constant 0 : index
      %c0_29 = arith.constant 0 : index
      %60 = vector.load %arg6[%c0_28, %c0_29] : memref<4x256xf32, #tpu.memory_space<vmem>>, vector<4x256xf32>
      tpu.vector_store %arg6[%c0_28, %c0_29], %59 {strides = array<i32>} : memref<4x256xf32, #tpu.memory_space<vmem>>, vector<4x256xf32>,
    } else {
    }
    %c0 = arith.constant 0 : index
    %c0_1 = arith.constant 0 : index
    %c0_2 = arith.constant 0 : index
    %3 = vector.load %arg2[%c0, %c0_1, %c0_2] : memref<1x4x256xf32, #tpu.memory_space<vmem>>, vector<1x4x256xf32>
    %4 = vector.shape_cast %3 : vector<1x4x256xf32> to vector<4x256xf32>
    %c0_3 = arith.constant 0 : index
    %c0_4 = arith.constant 0 : index
    %c0_5 = arith.constant 0 : index
    %5 = vector.load %arg3[%c0_3, %c0_4, %c0_5] : memref<1x1x256xi32, #tpu.memory_space<vmem>>, vector<1x1x256xi32>
    %6 = vector.shape_cast %5 : vector<1x1x256xi32> to vector<1x256xi32>
    %7 = tpu.iota {dimensions = array<i32: 1>} : vector<1x256xi32>
    %c256_i32 = arith.constant 256 : i32
    %8 = arith.muli %arg1, %c256_i32 : i32
    %9 = vector.broadcast %8 : i32 to vector<1x256xi32>
    %10 = arith.addi %9, %7 : vector<1x256xi32>
    %c256_i32_6 = arith.constant 256 : i32
    %11 = vector.broadcast %c256_i32_6 : i32 to vector<1x256xi32>
    %12 = arith.cmpi slt, %10, %11 : vector<1x256xi32>
    %c255_i32 = arith.constant 255 : i32
    %13 = vector.broadcast %c255_i32 : i32 to vector<1x256xi32>
    %14 = arith.cmpi ne, %6, %13 : vector<1x256xi32>
    %15 = arith.andi %12, %14 : vector<1x256xi1>
    %cst = arith.constant 1.000000e+00 : f32
    %cst_7 = arith.constant 0.000000e+00 : f32
    %16 = vector.broadcast %cst : f32 to vector<1x256xf32>
    %17 = vector.broadcast %cst_7 : f32 to vector<1x256xf32>
    %18 = arith.select %15, %16, %17 : vector<1x256xi1>, vector<1x256xf32>
    %cst_8 = arith.constant dense<0xFF800000> : vector<256xf32>
    %19 = vector.multi_reduction <maximumf>, %4, %cst_8 [0] : vector<4x256xf32> to vector<256xf32>
    %20 = vector.shape_cast %19 : vector<256xf32> to vector<1x256xf32>
    %21 = vector.broadcast %20 : vector<1x256xf32> to vector<4x256xf32>
    %22 = arith.subf %4, %21 : vector<4x256xf32>
    %23 = math.exp %22 : vector<4x256xf32>
    %cst_9 = arith.constant dense<0.000000e+00> : vector<256xf32>
    %24 = vector.multi_reduction <add>, %23, %cst_9 [0] : vector<4x256xf32> to vector<256xf32>
    %25 = vector.shape_cast %24 : vector<256xf32> to vector<1x256xf32>
    %26 = tpu.reciprocal %25 : vector<1x256xf32> -> vector<1x256xf32>
    %27 = arith.mulf %18, %26 : vector<1x256xf32>
    %28 = vector.broadcast %27 : vector<1x256xf32> to vector<4x256xf32>
    %29 = arith.mulf %23, %28 : vector<4x256xf32>
    %cst_10 = arith.constant 0.000000e+00 : f32
    %30 = vector.shape_cast %12 : vector<1x256xi1> to vector<1x256xi1>
    %31 = vector.broadcast %30 : vector<1x256xi1> to vector<4x256xi1>
    %32 = vector.broadcast %cst_10 : f32 to vector<4x256xf32>
    %33 = arith.select %31, %29, %32 : vector<4x256xi1>, vector<4x256xf32>
    %c0_i32_11 = arith.constant 0 : i32
    %c3_i32 = arith.constant 3 : i32
    %34 = vector.broadcast %c0_i32_11 : i32 to vector<1x256xi32>
    %35 = arith.maxsi %34, %6 : vector<1x256xi32>
    %36 = vector.broadcast %c3_i32 : i32 to vector<1x256xi32>
    %37 = arith.minsi %36, %35 : vector<1x256xi32>
    %38 = tpu.iota {dimensions = array<i32: 0>} : vector<4x256xi32>
    %39 = vector.broadcast %37 : vector<1x256xi32> to vector<4x256xi32>
    %40 = arith.cmpi eq, %38, %39 : vector<4x256xi32>
    %cst_12 = arith.constant 0.000000e+00 : f32
    %41 = vector.shape_cast %18 : vector<1x256xf32> to vector<1x256xf32>
    %42 = vector.broadcast %41 : vector<1x256xf32> to vector<4x256xf32>
    %43 = vector.broadcast %cst_12 : f32 to vector<4x256xf32>
    %44 = arith.select %40, %42, %43 : vector<4x256xi1>, vector<4x256xf32>
    %c0_13 = arith.constant 0 : index
    %c0_14 = arith.constant 0 : index
    %45 = vector.load %arg5[%c0_13, %c0_14] : memref<4x256xf32, #tpu.memory_space<vmem>>, vector<4x256xf32>
    %cst_15 = arith.constant 0.000000e+00 : f32
    %46 = vector.broadcast %cst_15 : f32 to vector<4x256xf32>
    %47 = arith.select %40, %33, %46 : vector<4x256xi1>, vector<4x256xf32>
    %48 = arith.addf %45, %47 : vector<4x256xf32>
    %c0_16 = arith.constant 0 : index
    %c0_17 = arith.constant 0 : index
    %49 = vector.load %arg5[%c0_16, %c0_17] : memref<4x256xf32, #tpu.memory_space<vmem>>, vector<4x256xf32>
    tpu.vector_store %arg5[%c0_16, %c0_17], %48 {strides = array<i32>} : memref<4x256xf32, #tpu.memory_space<vmem>>, vector<4x256xf32>,
    %c0_18 = arith.constant 0 : index
    %c0_19 = arith.constant 0 : index
    %50 = vector.load %arg6[%c0_18, %c0_19] : memref<4x256xf32, #tpu.memory_space<vmem>>, vector<4x256xf32>
    %51 = arith.addf %33, %44 : vector<4x256xf32>
    %52 = arith.addf %50, %51 : vector<4x256xf32>
    %c0_20 = arith.constant 0 : index
    %c0_21 = arith.constant 0 : index
    %53 = vector.load %arg6[%c0_20, %c0_21] : memref<4x256xf32, #tpu.memory_space<vmem>>, vector<4x256xf32>
    tpu.vector_store %arg6[%c0_20, %c0_21], %52 {strides = array<i32>} : memref<4x256xf32, #tpu.memory_space<vmem>>, vector<4x256xf32>,
    %c0_i32_22 = arith.constant 0 : i32
    %54 = arith.cmpi eq, %arg1, %c0_i32_22 : i32
    %55 = arith.extui %54 : i1 to i32
    %c0_i32_23 = arith.constant 0 : i32
    %56 = arith.cmpi ne, %55, %c0_i32_23 : i32
    scf.if %56 {
      %c0_24 = arith.constant 0 : index
      %c0_25 = arith.constant 0 : index
      %57 = vector.load %arg5[%c0_24, %c0_25] : memref<4x256xf32, #tpu.memory_space<vmem>>, vector<4x256xf32>
      %cst_26 = arith.constant dense<0.000000e+00> : vector<4xf32>
      %58 = vector.multi_reduction <add>, %57, %cst_26 [1] : vector<4x256xf32> to vector<4xf32>
      %59 = vector.shape_cast %58 : vector<4xf32> to vector<4x1xf32>
      %c0_27 = arith.constant 0 : index
      %c0_28 = arith.constant 0 : index
      %c0_29 = arith.constant 0 : index
      %60 = vector.load %arg4[%c0_27, %c0_28, %c0_29] : memref<1x4x2xf32, #tpu.memory_space<vmem>>, vector<1x4x1xf32>
      %61 = vector.shape_cast %60 : vector<1x4x1xf32> to vector<4x1xf32>
      %62 = vector.shape_cast %59 : vector<4x1xf32> to vector<1x4x1xf32>
      tpu.vector_store %arg4[%c0_27, %c0_28, %c0_29], %62 {strides = array<i32>} : memref<1x4x2xf32, #tpu.memory_space<vmem>>, vector<1x4x1xf32>,
      %c0_30 = arith.constant 0 : index
      %c0_31 = arith.constant 0 : index
      %63 = vector.load %arg6[%c0_30, %c0_31] : memref<4x256xf32, #tpu.memory_space<vmem>>, vector<4x256xf32>
      %cst_32 = arith.constant dense<0.000000e+00> : vector<4xf32>
      %64 = vector.multi_reduction <add>, %63, %cst_32 [1] : vector<4x256xf32> to vector<4xf32>
      %65 = vector.shape_cast %64 : vector<4xf32> to vector<4x1xf32>
      %c0_33 = arith.constant 0 : index
      %c0_34 = arith.constant 0 : index
      %c1 = arith.constant 1 : index
      %66 = vector.load %arg4[%c0_33, %c0_34, %c1] : memref<1x4x2xf32, #tpu.memory_space<vmem>>, vector<1x4x1xf32>
      %67 = vector.shape_cast %66 : vector<1x4x1xf32> to vector<4x1xf32>
      %68 = vector.shape_cast %65 : vector<4x1xf32> to vector<1x4x1xf32>
      tpu.vector_store %arg4[%c0_33, %c0_34, %c1], %68 {strides = array<i32>} : memref<1x4x2xf32, #tpu.memory_space<vmem>>, vector<1x4x1xf32>,
    } else {
    }
    return
  }
  func.func @transform_0(%arg0: i32, %arg1: i32) -> (i32, i32, i32) {
    %c0_i32 = arith.constant 0 : i32
    %c0_i32_0 = arith.constant 0 : i32
    return %arg0, %c0_i32, %arg1 : i32, i32, i32
  }
  func.func @transform_1(%arg0: i32, %arg1: i32) -> (i32, i32, i32) {
    %c0_i32 = arith.constant 0 : i32
    %c0_i32_0 = arith.constant 0 : i32
    return %arg0, %c0_i32, %arg1 : i32, i32, i32
  }
  func.func @transform_2(%arg0: i32, %arg1: i32) -> (i32, i32, i32) {
    %c0_i32 = arith.constant 0 : i32
    %c0_i32_0 = arith.constant 0 : i32
    %c0_i32_1 = arith.constant 0 : i32
    return %arg0, %c0_i32, %c0_i32_0 : i32, i32, i32
  }
}

</mosaic_0001>

<bundles_post_ra>
// kernel: dice_loss.1
= control target key start
LH: loop header
LB: loop body
LE: loop exit
PB: predicated region body
PF: predicated region fallthrough
CT: control target
= control target key end

     0   :  { %s543_s9 = smov 0   ;;  %s545_s10 = smov 0   ;;  %s592_s0 = inlined_call_operand.vmem [shape: f32[2,4,256], index: 0, kind: input, shape index: {}]   ;;  %s593_s1 = inlined_call_operand.vmem [shape: s32[2,1,256], index: 1, kind: input, shape index: {}]   ;;  %s594_s2 = inlined_call_operand.vmem [shape: f32[2,4,2], index: 2, kind: output, shape index: {}]  }
   0x1   :  { %s547_s11 = smov 0  }
   0x2 LB: > { %s24_s12 = sadd.s32 1, %s520_s10  ;;  %p459_p0 = scmp.ge.s32.totalorder %s524_s11, 1  ;;  %s524_s11 = sphi %s547_s11, %s12_s11   ;;  %s520_s10 = sphi %s545_s10, %s596_s10   ;;  %s516_s9 = sphi %s543_s9, %s595_s9  }
   0x3   : > { %p26_p1 = scmp.ge.s32.totalorder %s24_s12, 2  ;;  %p147_p2 = scmp.lt.s32.totalorder %s524_s11, 3 }
   0x5   : > { %s598_s12 = smov (%p26_p1, %s24_s12), 0  ;;  %p148_p3 = pnand %p459_p0, %p147_p2 }
   0x6   : > { %p181_p4 = scmp.lt.s32.totalorder (!%p148_p3), %s516_s9, 1 }
   0x7   : > { %151 = sbr.rel (%p148_p3) target bundleno = 239 (0xef), region = 28 }
   0xc   : > { %s600_s9 = smov (!%p181_p4, %s516_s9), 1  ;;  %vm239_vm0 = vcmask 1043456   ;;  %v222_v26 = vlaneseq  ;;  %v526_v39 = vmov 0   ;;  %v527_v45 = vmov 0.0  }
   0xd   : > { %s466_s13 = sshll.u32 %s600_s9, 3  ;;  %s462_s17 = sshll.u32 %s600_s9, 1  ;;  %vm360_vm8 = vcmask 3072   ;;  %vm371_vm9 = vcmask 11272  }
   0xe   : > { %s188_s16 = scalar_lea.vmem %s592_s0, %s466_s13  ;;  %s197_s20 = scalar_lea.vmem %s593_s1, %s462_s17  ;;  %v223_v32 = vshrl.u32 %v222_v26, 7 }
   0xf   : > { %v209_v0 = vld [vmem:[%s188_s16] sm:$0xff]  ;;  %s463_s21 = sshll.u32 %s600_s9, 2 }
  0x10   : > { %v237_v1 = vcombine.high %v209_v0, %v209_v0  ;;  %v240_v2 = vsel %vm239_vm0, %v209_v0, -inf  ;;  %v210_v31 = vld [vmem:[%s197_s20] sm:$0x3]  ;;  %v224_v37 = vsub.s32 0, %v223_v32  ;;  %v228_v41 = vsub.s32 1, %v223_v32  ;;  %s202_s24 = scalar_lea.vmem %s594_s2, %s463_s21 }
  0x11   : > { %v241_v3 = vrot.slane %v240_v2, 4  ;;  %vm220_vm1 = vcmp.ne.s32.totalorder %v210_v31, 255  ;;  %vm304_vm2 = vcmp.gt.s32.totalorder %v210_v31, 0 }
  0x12   : > { %v247_v4 = vsel %vm239_vm0, %v237_v1, -inf  ;;  %v221_v40 = vsel %vm220_vm1, 1, %v526_v39  ;;  %v305_v44 = vsel %vm304_vm2, %v210_v31, 0 }
  0x13   : > { %v242_v5 = vmax.f32 %v240_v2, %v241_v3  ;;  %v248_v6 = vrot.slane %v247_v4, 4  ;;  %v225_v42 = vrot.slane %v221_v40, %v224_v37  ;;  %v229_v43 = vrot.slane %v221_v40, %v228_v41 }
  0x14   : > { %vm306_vm5 = vcmp.lt.s32.totalorder %v305_v44, 3 }
  0x15   : > { %v243_v7 = vrot.slane %v242_v5, 2  ;;  %v249_v8 = vmax.f32 %v247_v4, %v248_v6  ;;  %vm230_vm3 = vcmp.ne.s32.totalorder %v225_v42, 0  ;;  %vm231_vm4 = vcmp.ne.s32.totalorder %v229_v43, 0 }
  0x16   : > { %v234_v46 = vsel %vm230_vm3, 1.0, %v527_v45  ;;  %v235_v48 = vsel %vm231_vm4, 1.0, %v527_v45  ;;  %v307_v49 = vsel %vm306_vm5, %v305_v44, 3 }
  0x17   : > { %v244_v9 = vmax.f32 %v242_v5, %v243_v7  ;;  %v250_v10 = vrot.slane %v249_v8, 2  ;;  %v313_v54 = vrot.slane %v307_v49, %v224_v37  ;;  %v323_v55 = vrot.slane %v234_v46, %v224_v37 }
  0x18   : > { %v317_v57 = vrot.slane %v307_v49, %v228_v41  ;;  %v327_v58 = vrot.slane %v235_v48, %v224_v37 }
  0x19   : > { %v245_v11 = vrot.slane %v244_v9, 1  ;;  %v251_v12 = vmax.f32 %v249_v8, %v250_v10  ;;  %vm318_vm6 = vcmp.eq.s32.totalorder %v223_v32, %v313_v54 }
  0x1a   : > { %v328_v60 = vsel %vm318_vm6, %v323_v55, 0.0  ;;  %vm319_vm7 = vcmp.eq.s32.totalorder %v223_v32, %v317_v57 }
  0x1b   : > { %v246_v13 = vmax.f32 %v244_v9, %v245_v11  ;;  %v252_v14 = vrot.slane %v251_v12, 1  ;;  %v329_v62 = vsel %vm319_vm7, %v327_v58, 0.0 }
  0x1d   : > { %v253_v15 = vmax.f32 %v251_v12, %v252_v14 }
  0x1f   : > { %v256_v16 = vcombine.low %v246_v13, %v253_v15 }
  0x21   : > { %v258_v17 = vsub.f32 %v209_v0, %v256_v16 }
  0x23   : > { %v259_v18 = vmul.f32 1.442695, %v258_v17 }
  0x25   : > { %496 = vpow2.f32 %v259_v18 }
  0x32   : > { %v497_v19 = vpop.eup %496 }
  0x33   : > { %v262_v20 = vcombine.high %v497_v19, %v497_v19  ;;  %v264_v21 = vsel %vm239_vm0, %v497_v19, 0.0 }
  0x34   : > { %v265_v22 = vrot.slane %v264_v21, 4 }
  0x35   : > { %v271_v23 = vsel %vm239_vm0, %v262_v20, 0.0 }
  0x36   : > { %v266_v24 = vadd.f32 %v265_v22, %v264_v21  ;;  %v272_v25 = vrot.slane %v271_v23, 4 }
  0x38   : > { %v267_v27 = vrot.slane %v266_v24, 2  ;;  %v273_v28 = vadd.f32 %v272_v25, %v271_v23 }
  0x3a   : > { %v268_v29 = vadd.f32 %v267_v27, %v266_v24  ;;  %v274_v30 = vrot.slane %v273_v28, 2 }
  0x3c   : > { %v269_v33 = vrot.slane %v268_v29, 1  ;;  %v275_v34 = vadd.f32 %v274_v30, %v273_v28 }
  0x3e   : > { %v270_v35 = vadd.f32 %v269_v33, %v268_v29  ;;  %v276_v36 = vrot.slane %v275_v34, 1 }
  0x40   : > { %v277_v38 = vadd.f32 %v276_v36, %v275_v34  ;;  %498 = vrcp.f32 %v270_v35 }
  0x42   : > { %500 = vrcp.f32 %v277_v38 }
  0x4d   : > { %v499_v47 = vpop.eup %498 }
  0x4e   : > { %v280_v50 = vmul.f32 %v499_v47, %v234_v46 }
  0x4f   : > { %v501_v51 = vpop.eup %500 }
  0x50   : > { %v281_v52 = vmul.f32 %v501_v51, %v235_v48  ;;  %v285_v53 = vrot.slane %v280_v50, %v224_v37 }
  0x52   : > { %v289_v56 = vrot.slane %v281_v52, %v224_v37 }
  0x54   : > { %v292_v59 = vcombine.low %v285_v53, %v289_v56 }
  0x56   : > { %v294_v61 = vmul.f32 %v497_v19, %v292_v59 }
  0x58   : > { %v300_v63 = vcombine.high %v294_v61, %v294_v61  ;;  %v331_v0 = vsel %vm318_vm6, %v294_v61, 0.0  ;;  %v340_v1 = vadd.f32 %v328_v60, %v294_v61 }
  0x5a   : > { %v332_v2 = vsel %vm319_vm7, %v300_v63, 0.0  ;;  %v341_v3 = vadd.f32 %v329_v62, %v300_v63 }
  0x5b   : > { %v335_v4 = vcombine.low %v331_v0, %v332_v2  ;;  %v467_v5 = vcombine.low %v332_v2, %v332_v2 }
  0x5c   : > { %v344_v6 = vcombine.low %v340_v1, %v341_v3  ;;  %v468_v7 = vcombine.low %v341_v3, %v341_v3 }
  0x5d   : > { %v355_v8 = vsel %vm239_vm0, %v335_v4, 0.0  ;;  %v356_v9 = vsel %vm239_vm0, %v467_v5, 0.0 }
  0x5e   : > { %v357_v10 = vadd.f32 %v356_v9, %v355_v8  ;;  %v366_v11 = vsel %vm239_vm0, %v344_v6, 0.0  ;;  %v367_v12 = vsel %vm239_vm0, %v468_v7, 0.0 }
  0x5f   : > { %v368_v13 = vadd.f32 %v367_v12, %v366_v11 }
  0x60   : > { %358 = vadd.xlane.f32.xlu0 %v357_v10 }
  0x64   : > { %369 = vadd.xlane.f32.xlu0 %v368_v13 }
  0xe9   : > { %v359_v14 = vpop.xlane.xlu0 %358 }
  0xea   : > { %361 = vst.msk [vmem:[%s202_s24] sm:$0xf] %vm360_vm8, %v359_v14 }
  0xed   : > { %v370_v15 = vpop.xlane.xlu0 %369 }
  0xee   : > { %372 = vst.msk [vmem:[%s202_s24] sm:$0xf] %vm371_vm9, %v370_v15 }
  0xef PF: > { %s12_s11 = sadd.s32 1, %s524_s11   ;;  %s595_s9 = smov %s520_s10 }
  0xf0   : > { %p9_p5 = scmp.ge.s32.totalorder %s12_s11, 4   ;;  %s596_s10 = smov %s598_s12 }
  0xf2   :  { %11 = sbr.rel (!%p9_p5) target bundleno = 2 (0x2), region = 69 }

</bundles_post_ra>
